<compile_context>
chip_gen: v5e
topology: v5e:2x2
jax: 0.10.0
libtpu: 0.0.40
codegen_flags: <defaults>
</compile_context>

<pallas_src>
import math

import jax
import jax.numpy as jnp
from jax import lax
from jax.experimental import pallas as pl
from jax.experimental.pallas import tpu as pltpu

_INV_SQRT2 = 0.7071067811865476
_SCALE_BOUND = 0.11
_LIKELIHOOD_BOUND = 1e-9


# ----------------------------------------------------------------------------
# In-kernel helpers
# ----------------------------------------------------------------------------
def _uniform_noise(seed_scalar, shape, row_tile, lane):
    """Uniform(-0.5, 0.5) noise from a counter-based hash of the global element
    index, so the result is independent of how the array is tiled over the grid."""
    row0 = pl.program_id(0) * row_tile
    rows = lax.broadcasted_iota(jnp.int32, shape, 0) + row0
    cols = lax.broadcasted_iota(jnp.int32, shape, 1)
    idx = (rows * lane + cols).astype(jnp.uint32)

    h = idx * jnp.uint32(0x9E3779B9) + seed_scalar.astype(jnp.uint32)
    h = h ^ (h >> 16)
    h = h * jnp.uint32(0x85EBCA6B)
    h = h ^ (h >> 13)
    h = h * jnp.uint32(0xC2B2AE35)
    h = h ^ (h >> 16)

    # Mantissa bit-trick: 23 random bits -> float32 in [1, 2) -> [-0.5, 0.5).
    mant = (h >> 9) | jnp.uint32(0x3F800000)
    u = lax.bitcast_convert_type(mant, jnp.float32)
    return u - jnp.float32(1.5)


def _likelihood_from(values, scales):
    s = jnp.maximum(scales, jnp.float32(_SCALE_BOUND))     # Low_bound(scales, 0.11)
    k = jnp.float32(_INV_SQRT2) / s                        # shared by both erf args
    upper = lax.erf((jnp.float32(0.5) - values) * k)
    lower = lax.erf((jnp.float32(-0.5) - values) * k)
    lik = jnp.float32(0.5) * (upper - lower)               # Phi(u) - Phi(l)
    return jnp.maximum(lik, jnp.float32(_LIKELIHOOD_BOUND))


# ----------------------------------------------------------------------------
# Kernels
# ----------------------------------------------------------------------------
def _gc_kernel_with_means(seed_ref, x_ref, scales_ref, means_ref, out_ref, lik_ref):
    rt, lane = x_ref.shape
    noise = _uniform_noise(seed_ref[0], x_ref.shape, rt, lane)
    outputs = x_ref[...] + noise
    out_ref[...] = outputs                   # write early: writeback overlaps the math below
    values = jnp.abs(outputs - means_ref[...])
    lik_ref[...] = _likelihood_from(values, scales_ref[...])


def _gc_kernel_no_means(seed_ref, x_ref, scales_ref, out_ref, lik_ref):
    rt, lane = x_ref.shape
    noise = _uniform_noise(seed_ref[0], x_ref.shape, rt, lane)
    outputs = x_ref[...] + noise
    out_ref[...] = outputs
    values = jnp.abs(outputs)                # means=None: no zero-means HBM stream
    lik_ref[...] = _likelihood_from(values, scales_ref[...])


# ----------------------------------------------------------------------------
# Wrapper
# ----------------------------------------------------------------------------
def _choose_slab(shape):
    """Flatten to a lane-dense 2-D slab (last dim a multiple of 128 when possible)."""
    total = math.prod(shape)
    for lane in (512, 1024, 2048, 256, 128):
        if total % lane == 0:
            return total // lane, lane
    # TODO(synk): trailing dims not divisible by 128 fall back to masked stores.
    lane = shape[-1]
    return total // lane, lane


def _choose_row_tile(rows, lane):
    # ~1 MiB f32 per array per buffer keeps the 8-10 double-buffered streams well
    # inside default scoped-VMEM limits on all of v5e / v6e / v7x.
    rt = max(1, (1 << 20) // (4 * lane))
    if rt >= rows:
        return rows
    return min(max(8, (rt // 8) * 8), rows)


def gaussian_conditional_forward(inputs, scales, means=None, seed=0):
    """Pallas port of GaussianConditional.forward.  Returns (outputs, likelihood)."""
    orig_shape = inputs.shape
    rows, lane = _choose_slab(orig_shape)
    row_tile = _choose_row_tile(rows, lane)

    x2 = inputs.reshape(rows, lane).astype(jnp.float32)
    s2 = scales.reshape(rows, lane).astype(jnp.float32)
    seed_arr = jnp.asarray([seed], dtype=jnp.int32)

    data_spec = pl.BlockSpec((row_tile, lane), lambda i: (i, 0))
    smem_spec = pl.BlockSpec(memory_space=pltpu.MemorySpace.SMEM)
    out_shapes = (jax.ShapeDtypeStruct((rows, lane), jnp.float32),
                  jax.ShapeDtypeStruct((rows, lane), jnp.float32))
    grid = (pl.cdiv(rows, row_tile),)
    cparams = pltpu.CompilerParams(dimension_semantics=("parallel",))

    if means is None:
        out, lik = pl.pallas_call(
            _gc_kernel_no_means,
            grid=grid,
            in_specs=[smem_spec, data_spec, data_spec],
            out_specs=(data_spec, data_spec),
            out_shape=out_shapes,
            compiler_params=cparams,
        )(seed_arr, x2, s2)
    else:
        m2 = means.reshape(rows, lane).astype(jnp.float32)
        out, lik = pl.pallas_call(
            _gc_kernel_with_means,
            grid=grid,
            in_specs=[smem_spec, data_spec, data_spec, data_spec],
            out_specs=(data_spec, data_spec),
            out_shape=out_shapes,
            compiler_params=cparams,
        )(seed_arr, x2, s2, m2)

    return out.reshape(orig_shape), lik.reshape(orig_shape)


# ----------------------------------------------------------------------------
# Self-test
# ----------------------------------------------------------------------------
def _likelihood_reference(outputs, scales, means):
    s = jnp.maximum(scales, _SCALE_BOUND)
    v = jnp.abs(outputs - means) if means is not None else jnp.abs(outputs)
    upper = 0.5 * lax.erfc(-(0.5 - v) / s * _INV_SQRT2)
    lower = 0.5 * lax.erfc(-(-0.5 - v) / s * _INV_SQRT2)
    return jnp.maximum(upper - lower, _LIKELIHOOD_BOUND)


if __name__ == "__main__":
    key = jax.random.PRNGKey(0)
    k1, k2 = jax.random.split(key)

    B, C, H, W = 2, 4, 16, 16
    inputs = jax.random.normal(k1, (B, C, H, W), dtype=jnp.float32) * 3.0
    scales = jax.random.uniform(k2, (B, C, H, W), dtype=jnp.float32,
                                minval=0.05, maxval=2.0)
    means = jnp.zeros((B, C, H, W), dtype=jnp.float32)

    # Explicit-means path and specialized means=None path.
    out_m, lik_m = gaussian_conditional_forward(inputs, scales, means, seed=0)
    out_n, lik_n = gaussian_conditional_forward(inputs, scales, None, seed=0)
    jax.block_until_ready((out_m, lik_m, out_n, lik_n))

    for out, lik, mu in ((out_m, lik_m, means), (out_n, lik_n, None)):
        assert out.shape == (B, C, H, W) and lik.shape == (B, C, H, W)
        # noise stays inside [-0.5, 0.5]
        assert bool(jnp.all(jnp.abs(out - inputs) <= 0.5))
        # likelihood is a valid, lower-bounded probability
        assert bool(jnp.all(lik >= _LIKELIHOOD_BOUND))
        assert bool(jnp.all(lik <= 1.0 + 1e-5))
        # matches the analytic Gaussian-CDF likelihood of the kernel's own outputs
        ref = _likelihood_reference(out, scales, mu)
        assert bool(jnp.allclose(lik, ref, atol=1e-5, rtol=1e-5))

    # same seed on both paths -> identical noise
    assert bool(jnp.allclose(out_m, out_n))

    print("KERNEL_OK")
</pallas_src>

<mosaic_0001>
module attributes {stable_mosaic.version = 11 : i64} {
  func.func @_gc_kernel_with_means(%arg0: i32, %arg1: memref<1xi32, #tpu.memory_space<smem>>, %arg2: memref<4x512xf32, #tpu.memory_space<vmem>>, %arg3: memref<4x512xf32, #tpu.memory_space<vmem>>, %arg4: memref<4x512xf32, #tpu.memory_space<vmem>>, %arg5: memref<4x512xf32, #tpu.memory_space<vmem>>, %arg6: memref<4x512xf32, #tpu.memory_space<vmem>>) attributes {dimension_semantics = [#tpu.dimension_semantics<parallel>], iteration_bounds = array<i64: 1>, scalar_prefetch = 0 : i64, scratch_operands = 0 : i64, tpu.core_type = #tpu.core_type<tc>, window_params = [{transform_indices = @transform_0, window_bounds = array<i64: 1>}, {transform_indices = @transform_1, window_bounds = array<i64: 4, 512>}, {transform_indices = @transform_2, window_bounds = array<i64: 4, 512>}, {transform_indices = @transform_3, window_bounds = array<i64: 4, 512>}, {transform_indices = @transform_4, window_bounds = array<i64: 4, 512>}, {transform_indices = @transform_5, window_bounds = array<i64: 4, 512>}]} {
    %c0 = arith.constant 0 : index
    %0 = memref.load %arg1[%c0] : memref<1xi32, #tpu.memory_space<smem>>
    %c4_i32 = arith.constant 4 : i32
    %1 = arith.muli %arg0, %c4_i32 : i32
    %2 = tpu.iota {dimensions = array<i32: 0>} : vector<4x512xi32>
    %3 = vector.broadcast %1 : i32 to vector<4x512xi32>
    %4 = arith.addi %2, %3 : vector<4x512xi32>
    %5 = tpu.iota {dimensions = array<i32: 1>} : vector<4x512xi32>
    %c512_i32 = arith.constant 512 : i32
    %6 = vector.broadcast %c512_i32 : i32 to vector<4x512xi32>
    %7 = arith.muli %4, %6 : vector<4x512xi32>
    %8 = arith.addi %7, %5 : vector<4x512xi32>
    %c-1640531527_i32 = arith.constant -1640531527 : i32
    %9 = vector.broadcast %c-1640531527_i32 : i32 to vector<4x512xi32>
    %10 = arith.muli %8, %9 : vector<4x512xi32>
    %11 = vector.broadcast %0 : i32 to vector<4x512xi32>
    %12 = arith.addi %10, %11 : vector<4x512xi32>
    %c16_i32 = arith.constant 16 : i32
    %13 = vector.broadcast %c16_i32 : i32 to vector<4x512xi32>
    %14 = arith.shrui %12, %13 : vector<4x512xi32>
    %15 = arith.xori %12, %14 : vector<4x512xi32>
    %c-2048144789_i32 = arith.constant -2048144789 : i32
    %16 = vector.broadcast %c-2048144789_i32 : i32 to vector<4x512xi32>
    %17 = arith.muli %15, %16 : vector<4x512xi32>
    %c13_i32 = arith.constant 13 : i32
    %18 = vector.broadcast %c13_i32 : i32 to vector<4x512xi32>
    %19 = arith.shrui %17, %18 : vector<4x512xi32>
    %20 = arith.xori %17, %19 : vector<4x512xi32>
    %c-1028477387_i32 = arith.constant -1028477387 : i32
    %21 = vector.broadcast %c-1028477387_i32 : i32 to vector<4x512xi32>
    %22 = arith.muli %20, %21 : vector<4x512xi32>
    %c16_i32_0 = arith.constant 16 : i32
    %23 = vector.broadcast %c16_i32_0 : i32 to vector<4x512xi32>
    %24 = arith.shrui %22, %23 : vector<4x512xi32>
    %25 = arith.xori %22, %24 : vector<4x512xi32>
    %c9_i32 = arith.constant 9 : i32
    %26 = vector.broadcast %c9_i32 : i32 to vector<4x512xi32>
    %27 = arith.shrui %25, %26 : vector<4x512xi32>
    %c1065353216_i32 = arith.constant 1065353216 : i32
    %28 = vector.broadcast %c1065353216_i32 : i32 to vector<4x512xi32>
    %29 = arith.ori %27, %28 : vector<4x512xi32>
    %30 = tpu.bitcast %29 : vector<4x512xi32> -> vector<4x512xf32>
    %cst = arith.constant 1.500000e+00 : f32
    %31 = vector.broadcast %cst : f32 to vector<4x512xf32>
    %32 = arith.subf %30, %31 : vector<4x512xf32>
    %c0_1 = arith.constant 0 : index
    %c0_2 = arith.constant 0 : index
    %33 = vector.load %arg2[%c0_1, %c0_2] : memref<4x512xf32, #tpu.memory_space<vmem>>, vector<4x512xf32>
    %34 = arith.addf %33, %32 : vector<4x512xf32>
    %c0_3 = arith.constant 0 : index
    %c0_4 = arith.constant 0 : index
    %35 = vector.load %arg5[%c0_3, %c0_4] : memref<4x512xf32, #tpu.memory_space<vmem>>, vector<4x512xf32>
    tpu.vector_store %arg5[%c0_3, %c0_4], %34 {strides = array<i32>} : memref<4x512xf32, #tpu.memory_space<vmem>>, vector<4x512xf32>,
    %c0_5 = arith.constant 0 : index
    %c0_6 = arith.constant 0 : index
    %36 = vector.load %arg4[%c0_5, %c0_6] : memref<4x512xf32, #tpu.memory_space<vmem>>, vector<4x512xf32>
    %37 = arith.subf %34, %36 : vector<4x512xf32>
    %38 = math.absf %37 : vector<4x512xf32>
    %c0_7 = arith.constant 0 : index
    %c0_8 = arith.constant 0 : index
    %39 = vector.load %arg3[%c0_7, %c0_8] : memref<4x512xf32, #tpu.memory_space<vmem>>, vector<4x512xf32>
    %cst_9 = arith.constant 1.100000e-01 : f32
    %40 = vector.broadcast %cst_9 : f32 to vector<4x512xf32>
    %41 = arith.maximumf %39, %40 : vector<4x512xf32>
    %cst_10 = arith.constant 0.707106769 : f32
    %42 = vector.broadcast %cst_10 : f32 to vector<4x512xf32>
    %43 = arith.divf %42, %41 : vector<4x512xf32>
    %cst_11 = arith.constant 5.000000e-01 : f32
    %44 = vector.broadcast %cst_11 : f32 to vector<4x512xf32>
    %45 = arith.subf %44, %38 : vector<4x512xf32>
    %46 = arith.mulf %45, %43 : vector<4x512xf32>
    %47 = math.erf %46 : vector<4x512xf32>
    %cst_12 = arith.constant -5.000000e-01 : f32
    %48 = vector.broadcast %cst_12 : f32 to vector<4x512xf32>
    %49 = arith.subf %48, %38 : vector<4x512xf32>
    %50 = arith.mulf %49, %43 : vector<4x512xf32>
    %51 = math.erf %50 : vector<4x512xf32>
    %52 = arith.subf %47, %51 : vector<4x512xf32>
    %cst_13 = arith.constant 5.000000e-01 : f32
    %53 = vector.broadcast %cst_13 : f32 to vector<4x512xf32>
    %54 = arith.mulf %53, %52 : vector<4x512xf32>
    %cst_14 = arith.constant 9.99999971E-10 : f32
    %55 = vector.broadcast %cst_14 : f32 to vector<4x512xf32>
    %56 = arith.maximumf %54, %55 : vector<4x512xf32>
    %c0_15 = arith.constant 0 : index
    %c0_16 = arith.constant 0 : index
    %57 = vector.load %arg6[%c0_15, %c0_16] : memref<4x512xf32, #tpu.memory_space<vmem>>, vector<4x512xf32>
    tpu.vector_store %arg6[%c0_15, %c0_16], %56 {strides = array<i32>} : memref<4x512xf32, #tpu.memory_space<vmem>>, vector<4x512xf32>,
    return
  }
  func.func @transform_0(%arg0: i32) -> i32 {
    %c0_i32 = arith.constant 0 : i32
    %c0_i32_0 = arith.constant 0 : i32
    return %c0_i32 : i32
  }
  func.func @transform_1(%arg0: i32) -> (i32, i32) {
    %c0_i32 = arith.constant 0 : i32
    %c0_i32_0 = arith.constant 0 : i32
    return %arg0, %c0_i32 : i32, i32
  }
  func.func @transform_2(%arg0: i32) -> (i32, i32) {
    %c0_i32 = arith.constant 0 : i32
    %c0_i32_0 = arith.constant 0 : i32
    return %arg0, %c0_i32 : i32, i32
  }
  func.func @transform_3(%arg0: i32) -> (i32, i32) {
    %c0_i32 = arith.constant 0 : i32
    %c0_i32_0 = arith.constant 0 : i32
    return %arg0, %c0_i32 : i32, i32
  }
  func.func @transform_4(%arg0: i32) -> (i32, i32) {
    %c0_i32 = arith.constant 0 : i32
    %c0_i32_0 = arith.constant 0 : i32
    return %arg0, %c0_i32 : i32, i32
  }
  func.func @transform_5(%arg0: i32) -> (i32, i32) {
    %c0_i32 = arith.constant 0 : i32
    %c0_i32_0 = arith.constant 0 : i32
    return %arg0, %c0_i32 : i32, i32
  }
}

</mosaic_0001>

<bundles_post_ra>
// kernel: tpu_custom_call.1
= control target key start
LH: loop header
LB: loop body
LE: loop exit
PB: predicated region body
PF: predicated region fallthrough
CT: control target
= control target key end

     0   :  { %12 = vsyncpa [#allocation4], 0  ;;  %s748_s0 = inlined_call_operand.<no memory space> [shape: s32[1], index: 0, kind: input, shape index: {}]   ;;  %s749_s1 = inlined_call_operand.hbm [shape: f32[4,512], index: 1, kind: input, shape index: {}]   ;;  %s750_s2 = inlined_call_operand.hbm [shape: f32[4,512], index: 2, kind: input, shape index: {}]   ;;  %s751_s3 = inlined_call_operand.hbm [shape: f32[4,512], index: 3, kind: input, shape index: {}]   ;;  %s752_s4 = inlined_call_operand.hbm [shape: f32[4,512], index: 4, kind: output, shape index: {0}]   ;;  %s753_s5 = inlined_call_operand.hbm [shape: f32[4,512], index: 5, kind: output, shape index: {1}]  }
   0x1   :  { %13 = vsyncpa [#allocation7], 0 }
   0x2   :  { %14 = vsyncpa [#allocation5], 0  ;;  %s34_s20 = sshll.u32 %s750_s2, 4  ;;  %s35_s20 = int_to_ptr.hbm [resolvable:$true] %s34_s20 }
   0x3   :  { %15 = vsyncpa [#allocation11], 0  ;;  %s556_s21 = smov [#allocation6]   ;;  %s23_s25 = sshll.u32 %s749_s1, 4  ;;  %s24_s25 = int_to_ptr.hbm [resolvable:$true] %s23_s25 }
   0x4   :  { %s36_s22 = sshll.u32 %s556_s21, 4  ;;  %s557_s26 = smov [#allocation3]   ;;  %s37_s22 = int_to_ptr.vmem [resolvable:$true] %s36_s22 }
   0x5   :  { %39 = dma.hbm_to_vmem [thread:$0]  %s35_s20, 256, %s37_s22, [#allocation7]  }
   0x6   :  { %s25_s27 = sshll.u32 %s557_s26, 4  ;;  %s45_s30 = sshll.u32 %s751_s3, 4  ;;  %s26_s27 = int_to_ptr.vmem [resolvable:$true] %s25_s27  ;;  %s46_s30 = int_to_ptr.hbm [resolvable:$true] %s45_s30 }
   0x7   :  { %28 = dma.hbm_to_vmem [thread:$0]  %s24_s25, 256, %s26_s27, [#allocation4]  }
   0x8   :  { %s558_s2 = smov [#allocation8]  }
   0x9   :  { %s47_s6 = sshll.u32 %s558_s2, 4  ;;  %s48_s6 = int_to_ptr.vmem [resolvable:$true] %s47_s6 }
   0xa   :  { %50 = dma.hbm_to_vmem [thread:$0]  %s46_s30, 256, %s48_s6, [#allocation7]  }
   0xb   :  { %548 = dma.done.wait [#allocation4], 256  }
   0xc   :  { %549 = vsyncadd [#allocation4], 4294967040 }
   0xd   :  { %550 = dma.done.wait [#allocation7], 512  }
   0xe   :  { %551 = vsyncadd [#allocation7], 4294966784  ;;  %v65_v0 = vlaneseq  ;;  %v83_v11 = vstv %s748_s0  ;;  %v159_v12 = vld [vmem:[#allocation6] sm:$0xff]  ;;  %v160_v20 = vld [vmem:[#allocation6 + $0x8] sm:$0xff]  ;;  %vm144_vm5 = vcmask 1043456   ;;  %s559_s0 = smov [#allocation9]  }
   0xf   :  { %v603_v15 = vmax.f32 %v159_v12, 0.11  ;;  %v606_v25 = vmax.f32 %v160_v20, 0.11  ;;  %s374_s7 = sshll.u32 %s559_s0, 4  ;;  %s376_s10 = sshll.u32 %s752_s4, 4  ;;  %s375_s7 = int_to_ptr.vmem [resolvable:$true] %s374_s7  ;;  %s377_s10 = int_to_ptr.hbm [resolvable:$true] %s376_s10 }
  0x10   :  { %v66_v1 = vshrl.u32 %v65_v0, 7  ;;  %v70_v2 = vand.u32 127, %v65_v0  ;;  %s560_s4 = smov [#allocation10]   ;;  %s387_s14 = sshll.u32 %s753_s5, 4  ;;  %s388_s14 = int_to_ptr.hbm [resolvable:$true] %s387_s14 }
  0x11   :  { %416 = vrcp.f32 %v603_v15  ;;  %vm168_vm0 = vweird.f32 %v603_v15  ;;  %vm183_vm2 = vweird.f32 %v606_v25  ;;  %s385_s11 = sshll.u32 %s560_s4, 4  ;;  %s386_s11 = int_to_ptr.vmem [resolvable:$true] %s385_s11 }
  0x12   :  { %v71_v3 = vadd.s32 128, %v70_v2  ;;  %v74_v4 = vmul.u32 512, %v66_v1  ;;  %v72_v5 = vadd.s32 256, %v70_v2  ;;  %v73_v6 = vadd.s32 384, %v70_v2 }
  0x13   :  { %418 = vrcp.f32 %v606_v25  ;;  %v172_v1 = vand.u32 2147483647, %v603_v15 }
  0x14   :  { %v75_v7 = vadd.s32 %v74_v4, %v70_v2  ;;  %v76_v8 = vadd.s32 %v74_v4, %v71_v3  ;;  %v77_v9 = vadd.s32 %v74_v4, %v72_v5  ;;  %v78_v10 = vadd.s32 %v74_v4, %v73_v6 }
  0x15   :  { %v174_v3 = vand.u32 2147483648, %v603_v15  ;;  %vm173_vm7 = vcmp.eq.f32.partialorder %v172_v1, 8.507059e+37 }
  0x16   :  { %v79_v13 = vmul.u32 2654435769, %v75_v7  ;;  %v80_v14 = vmul.u32 2654435769, %v76_v8  ;;  %v81_v16 = vmul.u32 2654435769, %v77_v9 }
  0x17   :  { %v82_v17 = vmul.u32 2654435769, %v78_v10  ;;  %v609_v32 = vpop.eup %416 }
  0x18   :  { %v84_v18 = vadd.s32 %v83_v11, %v79_v13  ;;  %v85_v19 = vadd.s32 %v83_v11, %v80_v14  ;;  %v86_v21 = vadd.s32 %v83_v11, %v81_v16  ;;  %v164_v39 = vmul.f32 %v609_v32, %v603_v15 }
  0x19   :  { %v87_v22 = vadd.s32 %v83_v11, %v82_v17  ;;  %v613_v42 = vpop.eup %418  ;;  %vm169_vm1 = vweird.f32 %v609_v32  ;;  %v189_v11 = vand.u32 2147483648, %v606_v25  ;;  %v187_v17 = vand.u32 2147483647, %v606_v25 }
  0x1a   :  { %v88_v23 = vshrl.u32 %v84_v18, 16  ;;  %v89_v24 = vshrl.u32 %v85_v19, 16  ;;  %v90_v26 = vshrl.u32 %v86_v21, 16  ;;  %v179_v47 = vmul.f32 %v613_v42, %v606_v25  ;;  %vm629_vm4 = vmor %vm168_vm0, %vm169_vm1 }
  0x1b   :  { %v91_v27 = vshrl.u32 %v87_v22, 16  ;;  %v165_v50 = vsub.f32 1.0, %v164_v39  ;;  %vm184_vm3 = vweird.f32 %v613_v42  ;;  %vm188_vm8 = vcmp.eq.f32.partialorder %v187_v17, 8.507059e+37 }
  0x1c   :  { %v92_v28 = vxor.u32 %v88_v23, %v84_v18  ;;  %v93_v29 = vxor.u32 %v89_v24, %v85_v19  ;;  %v94_v30 = vxor.u32 %v90_v26, %v86_v21  ;;  %v180_v55 = vsub.f32 1.0, %v179_v47  ;;  %vm635_vm6 = vmor %vm183_vm2, %vm184_vm3  ;;  %v136_v21 = vld [vmem:[#allocation3] sm:$0xff]  ;;  %v137_v24 = vld [vmem:[#allocation3 + $0x8] sm:$0xff] }
  0x1d   :  { %v95_v31 = vxor.u32 %v91_v27, %v87_v22  ;;  %v166_v60 = vmul.f32 %v609_v32, %v165_v50  ;;  %v175_v23 = vor.u32 1.1754944e-38, %v174_v3  ;;  %v190_v27 = vor.u32 1.1754944e-38, %v189_v11 }
  0x1e   :  { %v96_v33 = vmul.u32 2246822507, %v92_v28  ;;  %v97_v34 = vmul.u32 2246822507, %v93_v29  ;;  %v98_v35 = vmul.u32 2246822507, %v94_v30  ;;  %v181_v2 = vmul.f32 %v613_v42, %v180_v55 }
  0x1f   :  { %v99_v36 = vmul.u32 2246822507, %v95_v31  ;;  %v167_v8 = vadd.f32 %v609_v32, %v166_v60  ;;  %v153_v28 = vld [vmem:[#allocation8] sm:$0xff] }
  0x20   :  { %v100_v37 = vshrl.u32 %v96_v33, 13  ;;  %v101_v38 = vshrl.u32 %v97_v34, 13  ;;  %v102_v40 = vshrl.u32 %v98_v35, 13  ;;  %v182_v16 = vadd.f32 %v613_v42, %v181_v2 }
  0x21   :  { %v103_v41 = vshrl.u32 %v99_v36, 13  ;;  %v171_v15 = vsel %vm629_vm4, %v609_v32, %v167_v8  ;;  %v154_v32 = vld [vmem:[#allocation8 + $0x8] sm:$0xff] }
  0x22   :  { %v104_v43 = vxor.u32 %v100_v37, %v96_v33  ;;  %v105_v44 = vxor.u32 %v101_v38, %v97_v34  ;;  %v106_v45 = vxor.u32 %v102_v40, %v98_v35  ;;  %v186_v29 = vsel %vm635_vm6, %v613_v42, %v182_v16 }
  0x23   :  { %v107_v46 = vxor.u32 %v103_v41, %v99_v36  ;;  %v176_v33 = vsel %vm173_vm7, %v175_v23, %v171_v15  ;;  %v191_v36 = vsel %vm188_vm8, %v190_v27, %v186_v29 }
  0x24   :  { %v108_v48 = vmul.u32 3266489909, %v104_v43  ;;  %v109_v49 = vmul.u32 3266489909, %v105_v44  ;;  %v110_v51 = vmul.u32 3266489909, %v106_v45 }
  0x25   :  { %v111_v52 = vmul.u32 3266489909, %v107_v46  ;;  %v177_v39 = vmul.f32 0.70710677, %v176_v33  ;;  %v192_v41 = vmul.f32 0.70710677, %v191_v36 }
  0x26   :  { %v112_v53 = vshrl.u32 %v108_v48, 16  ;;  %v113_v54 = vshrl.u32 %v109_v49, 16  ;;  %v114_v56 = vshrl.u32 %v110_v51, 16 }
  0x27   :  { %v115_v57 = vshrl.u32 %v111_v52, 16 }
  0x28   :  { %v116_v58 = vxor.u32 %v112_v53, %v108_v48  ;;  %v117_v59 = vxor.u32 %v113_v54, %v109_v49  ;;  %v118_v61 = vxor.u32 %v114_v56, %v110_v51 }
  0x29   :  { %v119_v62 = vxor.u32 %v115_v57, %v111_v52 }
  0x2a   :  { %v120_v63 = vshrl.u32 %v116_v58, 9  ;;  %v121_v0 = vshrl.u32 %v117_v59, 9  ;;  %v122_v4 = vshrl.u32 %v118_v61, 9 }
  0x2b   :  { %v123_v5 = vshrl.u32 %v119_v62, 9 }
  0x2c   :  { %v124_v6 = vor.u32 1065353216, %v120_v63  ;;  %v125_v7 = vor.u32 1065353216, %v121_v0  ;;  %v126_v9 = vor.u32 1065353216, %v122_v4 }
  0x2d   :  { %v127_v10 = vor.u32 1065353216, %v123_v5 }
  0x2e   :  { %v403_v12 = vadd.f32 -1.5, %v124_v6  ;;  %v404_v13 = vadd.f32 -1.5, %v125_v7  ;;  %v405_v18 = vadd.f32 -1.5, %v126_v9 }
  0x2f   :  { %v406_v19 = vadd.f32 -1.5, %v127_v10 }
  0x30   :  { %v142_v22 = vrot.slane %v404_v13, 4 }
  0x31   :  { %v143_v26 = vrot.slane %v406_v19, 4 }
  0x32   :  { %v145_v25 = vsel %vm144_vm5, %v403_v12, %v142_v22 }
  0x33   :  { %v149_v30 = vadd.f32 %v145_v25, %v136_v21  ;;  %v146_v31 = vsel %vm144_vm5, %v405_v18, %v143_v26 }
  0x34   :  { %v150_v34 = vadd.f32 %v146_v31, %v137_v24 }
  0x35   :  { %151 = vst [vmem:[#allocation9] sm:$0xff] %v149_v30  ;;  %v155_v35 = vsub.f32 %v149_v30, %v153_v28 }
  0x36   :  { %152 = vst [vmem:[#allocation9 + $0x8] sm:$0xff] %v150_v34  ;;  %v156_v37 = vsub.f32 %v150_v34, %v154_v32 }
  0x37   :  { %v157_v38 = vand.u32 2147483647, %v155_v35  ;;  %379 = dma.vmem_to_hbm [thread:$0]  %s375_s7, 256, %s377_s10, [#allocation5]  }
  0x38   :  { %v158_v40 = vand.u32 2147483647, %v156_v37 }
  0x39   :  { %v193_v42 = vsub.f32 0.5, %v157_v38  ;;  %v277_v43 = vsub.f32 -0.5, %v157_v38 }
  0x3a   :  { %v194_v44 = vsub.f32 0.5, %v158_v40  ;;  %v278_v45 = vsub.f32 -0.5, %v158_v40 }
  0x3b   :  { %v650_v46 = vmul.f32 %v193_v42, %v177_v39  ;;  %v652_v47 = vmul.f32 %v277_v43, %v177_v39 }
  0x3c   :  { %v654_v48 = vmul.f32 %v194_v44, %v192_v41  ;;  %v656_v49 = vmul.f32 %v278_v45, %v192_v41 }
  0x3d   :  { %v197_v50 = vmul.f32 %v650_v46, %v650_v46  ;;  %v281_v51 = vmul.f32 %v652_v47, %v652_v47 }
  0x3e   :  { %v237_v52 = vmul.f32 %v654_v48, %v654_v48  ;;  %v321_v53 = vmul.f32 %v656_v49, %v656_v49 }
  0x3f   :  { %v666_v54 = vmin.f32 %v197_v50, 16.0  ;;  %v668_v55 = vmin.f32 %v281_v51, 16.0 }
  0x40   :  { %v670_v56 = vmin.f32 %v237_v52, 16.0  ;;  %v672_v57 = vmin.f32 %v321_v53, 16.0 }
  0x41   :  { %v199_v58 = vmul.f32 2.1237322e-06, %v666_v54  ;;  %v210_v59 = vmul.f32 3.8918573e-05, %v666_v54  ;;  %v283_v60 = vmul.f32 2.1237322e-06, %v668_v55 }
  0x42   :  { %v294_v61 = vmul.f32 3.8918573e-05, %v668_v55  ;;  %v239_v62 = vmul.f32 2.1237322e-06, %v670_v56  ;;  %v250_v63 = vmul.f32 3.8918573e-05, %v670_v56 }
  0x43   :  { %v200_v0 = vadd.f32 0.00028619796, %v199_v58  ;;  %v211_v1 = vadd.f32 0.001143296, %v210_v59  ;;  %v284_v2 = vadd.f32 0.00028619796, %v283_v60 }
  0x44   :  { %v295_v3 = vadd.f32 0.001143296, %v294_v61  ;;  %v240_v4 = vadd.f32 0.00028619796, %v239_v62  ;;  %v251_v5 = vadd.f32 0.001143296, %v250_v63 }
  0x45   :  { %v201_v6 = vmul.f32 %v200_v0, %v666_v54  ;;  %v212_v7 = vmul.f32 %v211_v1, %v666_v54  ;;  %v285_v8 = vmul.f32 %v284_v2, %v668_v55  ;;  %v323_v9 = vmul.f32 2.1237322e-06, %v672_v57 }
  0x46   :  { %v296_v10 = vmul.f32 %v295_v3, %v668_v55  ;;  %v241_v11 = vmul.f32 %v240_v4, %v670_v56  ;;  %v252_v12 = vmul.f32 %v251_v5, %v670_v56  ;;  %v334_v13 = vmul.f32 3.8918573e-05, %v672_v57 }
  0x47   :  { %v202_v14 = vadd.f32 0.0036580483, %v201_v6  ;;  %v213_v16 = vadd.f32 0.014752088, %v212_v7  ;;  %v286_v17 = vadd.f32 0.0036580483, %v285_v8 }
  0x48   :  { %v297_v18 = vadd.f32 0.014752088, %v296_v10  ;;  %v242_v19 = vadd.f32 0.0036580483, %v241_v11  ;;  %v253_v20 = vadd.f32 0.014752088, %v252_v12 }
  0x49   :  { %v203_v21 = vmul.f32 %v202_v14, %v666_v54  ;;  %v214_v22 = vmul.f32 %v213_v16, %v666_v54  ;;  %v287_v23 = vmul.f32 %v286_v17, %v668_v55  ;;  %v324_v15 = vadd.f32 0.00028619796, %v323_v9 }
  0x4a   :  { %v298_v24 = vmul.f32 %v297_v18, %v668_v55  ;;  %v243_v26 = vmul.f32 %v242_v19, %v670_v56  ;;  %v254_v27 = vmul.f32 %v253_v20, %v670_v56  ;;  %v335_v25 = vadd.f32 0.001143296, %v334_v13 }
  0x4b   :  { %v204_v28 = vadd.f32 0.05243302, %v203_v21  ;;  %v215_v29 = vadd.f32 0.112945676, %v214_v22  ;;  %v288_v30 = vadd.f32 0.05243302, %v287_v23  ;;  %v325_v31 = vmul.f32 %v324_v15, %v672_v57 }
  0x4c   :  { %v299_v32 = vadd.f32 0.112945676, %v298_v24  ;;  %v244_v33 = vadd.f32 0.05243302, %v243_v26  ;;  %v255_v34 = vadd.f32 0.112945676, %v254_v27  ;;  %v336_v35 = vmul.f32 %v335_v25, %v672_v57 }
  0x4d   :  { %v205_v36 = vmul.f32 %v204_v28, %v666_v54  ;;  %v216_v37 = vmul.f32 %v215_v29, %v666_v54  ;;  %v289_v38 = vmul.f32 %v288_v30, %v668_v55  ;;  %v326_v45 = vadd.f32 0.0036580483, %v325_v31 }
  0x4e   :  { %v300_v39 = vmul.f32 %v299_v32, %v668_v55  ;;  %v256_v40 = vmul.f32 %v255_v34, %v670_v56  ;;  %v337_v41 = vadd.f32 0.014752088, %v336_v35  ;;  %v245_v44 = vmul.f32 %v244_v33, %v670_v56 }
  0x4f   :  { %v206_v42 = vadd.f32 0.18741608, %v205_v36  ;;  %v217_v43 = vadd.f32 0.4994258, %v216_v37  ;;  %v290_v58 = vadd.f32 0.18741608, %v289_v38  ;;  %v327_v1 = vmul.f32 %v326_v45, %v672_v57 }
  0x50   :  { %v301_v50 = vadd.f32 0.4994258, %v300_v39  ;;  %v257_v51 = vadd.f32 0.4994258, %v256_v40  ;;  %v338_v52 = vmul.f32 %v337_v41, %v672_v57  ;;  %v246_v0 = vadd.f32 0.18741608, %v245_v44 }
  0x51   :  { %v218_v53 = vmul.f32 %v217_v43, %v666_v54  ;;  %v207_v62 = vmul.f32 %v206_v42, %v666_v54  ;;  %v291_v4 = vmul.f32 %v290_v58, %v668_v55  ;;  %v328_v8 = vadd.f32 0.05243302, %v327_v1 }
  0x52   :  { %v302_v59 = vmul.f32 %v301_v50, %v668_v55  ;;  %v258_v60 = vmul.f32 %v257_v51, %v670_v56  ;;  %v339_v61 = vadd.f32 0.112945676, %v338_v52  ;;  %v247_v7 = vmul.f32 %v246_v0, %v670_v56 }
  0x53   :  { %v219_v63 = vadd.f32 1.0, %v218_v53  ;;  %v208_v6 = vadd.f32 1.1283791, %v207_v62  ;;  %v292_v54 = vadd.f32 1.1283791, %v291_v4  ;;  %v329_v13 = vmul.f32 %v328_v8, %v672_v57 }
  0x54   :  { %v303_v2 = vadd.f32 1.0, %v302_v59  ;;  %v708_v3 = vadd.f32 1.0, %v258_v60  ;;  %v340_v5 = vmul.f32 %v339_v61, %v672_v57  ;;  %v248_v12 = vadd.f32 1.1283791, %v247_v7 }
  0x55   :  { %420 = vrcp.f32 %v219_v63  ;;  %v209_v11 = vmul.f32 %v208_v6, %v650_v46  ;;  %vm225_vm9 = vweird.f32 %v219_v63  ;;  %v231_v55 = vand.u32 2147483648, %v219_v63 }
  0x56   :  { %422 = vrcp.f32 %v303_v2  ;;  %v341_v9 = vadd.f32 0.4994258, %v340_v5  ;;  %v229_v18 = vand.u32 2147483647, %v219_v63  ;;  %v293_v56 = vmul.f32 %v292_v54, %v652_v47 }
  0x57   :  { %424 = vrcp.f32 %v708_v3  ;;  %vm309_vm10 = vweird.f32 %v303_v2  ;;  %v315_v22 = vand.u32 2147483648, %v303_v2  ;;  %v313_v15 = vand.u32 2147483647, %v303_v2 }
  0x58   :  { %v342_v17 = vmul.f32 %v341_v9, %v672_v57  ;;  %v232_v27 = vor.u32 1.1754944e-38, %v231_v55  ;;  %v330_v25 = vadd.f32 0.18741608, %v329_v13  ;;  %vm265_vm14 = vweird.f32 %v708_v3 }
  0x59   :  { %vm230_vm0 = vcmp.eq.f32.partialorder %v229_v18, 8.507059e+37  ;;  %v316_v32 = vor.u32 1.1754944e-38, %v315_v22  ;;  %v271_v33 = vand.u32 2147483648, %v708_v3  ;;  %vm314_vm2 = vcmp.eq.f32.partialorder %v313_v15, 8.507059e+37 }
  0x5a   :  { %v343_v23 = vadd.f32 1.0, %v342_v17  ;;  %v269_v36 = vand.u32 2147483647, %v708_v3  ;;  %v331_v39 = vmul.f32 %v330_v25, %v672_v57  ;;  %v249_v50 = vmul.f32 %v248_v12, %v654_v48 }
  0x5b   :  { %v421_v10 = vpop.eup %420  ;;  %v272_v51 = vor.u32 1.1754944e-38, %v271_v33 }
  0x5c   :  { %v423_v14 = vpop.eup %422  ;;  %v221_v16 = vmul.f32 %v421_v10, %v219_v63  ;;  %vm226_vm11 = vweird.f32 %v421_v10  ;;  %426 = vrcp.f32 %v343_v23  ;;  %vm270_vm4 = vcmp.eq.f32.partialorder %v269_v36, 8.507059e+37 }
  0x5d   :  { %v305_v19 = vmul.f32 %v423_v14, %v303_v2  ;;  %v425_v20 = vpop.eup %424  ;;  %vm310_vm12 = vweird.f32 %v423_v14  ;;  %vm720_vm13 = vmor %vm225_vm9, %vm226_vm11  ;;  %v332_v60 = vadd.f32 1.1283791, %v331_v39  ;;  %vm349_vm5 = vweird.f32 %v343_v23 }
  0x5e   :  { %v222_v21 = vsub.f32 1.0, %v221_v16  ;;  %v261_v24 = vmul.f32 %v425_v20, %v708_v3  ;;  %vm266_vm15 = vweird.f32 %v425_v20  ;;  %vm726_vm1 = vmor %vm309_vm10, %vm310_vm12  ;;  %v355_v57 = vand.u32 2147483648, %v343_v23 }
  0x5f   :  { %v306_v46 = vsub.f32 1.0, %v305_v19  ;;  %vm734_vm3 = vmor %vm265_vm14, %vm266_vm15  ;;  %v353_v63 = vand.u32 2147483647, %v343_v23  ;;  %v333_v48 = vmul.f32 %v332_v60, %v656_v49 }
  0x60   :  { %v223_v26 = vmul.f32 %v421_v10, %v222_v21  ;;  %v262_v29 = vsub.f32 1.0, %v261_v24  ;;  %v356_v3 = vor.u32 1.1754944e-38, %v355_v57 }
  0x61   :  { %v307_v47 = vmul.f32 %v423_v14, %v306_v46  ;;  %vm354_vm8 = vcmp.eq.f32.partialorder %v353_v63, 8.507059e+37 }
  0x62   :  { %v224_v30 = vadd.f32 %v421_v10, %v223_v26  ;;  %v263_v35 = vmul.f32 %v425_v20, %v262_v29  ;;  %v427_v43 = vpop.eup %426 }
  0x63   :  { %v308_v34 = vadd.f32 %v423_v14, %v307_v47  ;;  %v345_v58 = vmul.f32 %v427_v43, %v343_v23  ;;  %vm350_vm6 = vweird.f32 %v427_v43 }
  0x64   :  { %v228_v37 = vsel %vm720_vm13, %v421_v10, %v224_v30  ;;  %v264_v42 = vadd.f32 %v425_v20, %v263_v35  ;;  %vm351_vm7 = vmor %vm349_vm5, %vm350_vm6 }
  0x65   :  { %v233_v40 = vsel %vm230_vm0, %v232_v27, %v228_v37  ;;  %v312_v41 = vsel %vm726_vm1, %v423_v14, %v308_v34  ;;  %v346_v62 = vsub.f32 1.0, %v345_v58 }
  0x66   :  { %v234_v44 = vmul.f32 %v233_v40, %v209_v11  ;;  %v317_v45 = vsel %vm314_vm2, %v316_v32, %v312_v41  ;;  %v268_v53 = vsel %vm734_vm3, %v425_v20, %v264_v42 }
  0x67   :  { %v318_v52 = vmul.f32 %v317_v45, %v293_v56  ;;  %v273_v0 = vsel %vm270_vm4, %v272_v51, %v268_v53  ;;  %v347_v2 = vmul.f32 %v427_v43, %v346_v62 }
  0x68   :  { %v407_v59 = vclamps-f32 %v234_v44, 1.0  ;;  %v274_v5 = vmul.f32 %v273_v0, %v249_v50 }
  0x69   :  { %v409_v61 = vclamps-f32 %v318_v52, 1.0  ;;  %v348_v6 = vadd.f32 %v427_v43, %v347_v2 }
  0x6a   :  { %v408_v9 = vclamps-f32 %v274_v5, 1.0 }
  0x6b   :  { %v361_v1 = vsub.f32 %v407_v59, %v409_v61  ;;  %v352_v8 = vsel %vm351_vm7, %v427_v43, %v348_v6 }
  0x6c   :  { %v357_v54 = vsel %vm354_vm8, %v356_v3, %v352_v8 }
  0x6d   :  { %v363_v4 = vmul.f32 0.5, %v361_v1  ;;  %v358_v10 = vmul.f32 %v357_v54, %v333_v48 }
  0x6f   :  { %v365_v7 = vmax.f32 %v363_v4, 1e-09  ;;  %v410_v11 = vclamps-f32 %v358_v10, 1.0 }
  0x71   :  { %367 = vst [vmem:[#allocation10] sm:$0xff] %v365_v7  ;;  %v362_v12 = vsub.f32 %v408_v9, %v410_v11 }
  0x73   :  { %v364_v49 = vmul.f32 0.5, %v362_v12 }
  0x75   :  { %v366_v13 = vmax.f32 %v364_v49, 1e-09 }
  0x77   :  { %368 = vst [vmem:[#allocation10 + $0x8] sm:$0xff] %v366_v13 }
  0x78   :  { %390 = dma.vmem_to_hbm [thread:$0]  %s386_s11, 256, %s388_s14, [#allocation11]  }
  0x79   :  { %552 = dma.done.wait [#allocation5], 256  }
  0x7a   :  { %553 = vsyncadd [#allocation5], 4294967040 }
  0x7b   :  { %554 = dma.done.wait [#allocation11], 256  }
  0x7c   :  { %555 = vsyncadd [#allocation11], 4294967040 }
  0x7d   :  { %399 = vsyncpa [#allocation4], 1 }
  0x7e   :  { %400 = vsyncpa [#allocation7], 1 }
  0x7f   :  { %401 = vsyncpa [#allocation5], 1 }
  0x80   :  { %402 = vsyncpa [#allocation11], 1 }

</bundles_post_ra>
